<compile_context>
chip_gen: v7x
topology: tpu7x:2x2x1
jax: 0.10.0
libtpu: 0.0.40
codegen_flags: <defaults>
</compile_context>

<pallas_src>
import jax
import jax.numpy as jnp
from jax.experimental import pallas as pl
from jax.experimental.pallas import tpu as pltpu


def _patch_merge_kernel(x_ref, w_ref, rs_ref, b_ref, o_ref):
    """Fused LayerNorm(4c) + Linear(4c -> 2c, bias=False) on one token tile.

    x_ref  : [4c, T]   stacked 2x2 patch features (channels-first tokens)
    w_ref  : [2c, 4c]  reduction weight with LN gamma folded in
    rs_ref : [2c, 1]   f32 row-sums of w_ref (for the mean term)
    b_ref  : [2c, 1]   f32 folded bias  W @ beta
    o_ref  : [2c, T]
    """
    x = x_ref[...]
    x32 = x.astype(jnp.float32)
    inv_c4 = 1.0 / x.shape[0]

    # One-pass LayerNorm statistics over the 4c feature axis (f32 accumulation).
    mean = jnp.sum(x32, axis=0, keepdims=True) * inv_c4            # [1, T]
    ex2 = jnp.sum(x32 * x32, axis=0, keepdims=True) * inv_c4       # [1, T]
    inv_std = jax.lax.rsqrt(ex2 - mean * mean + 1e-5)              # [1, T] (EUP)

    # Raw matmul in the input's storage dtype; normalization in the epilogue:
    #   y = ((W*g) @ x - mean * rowsum(W*g)) * inv_std + W @ beta
    acc = jnp.dot(w_ref[...], x, preferred_element_type=jnp.float32)   # [2c, T]
    out = (acc - rs_ref[...] * mean) * inv_std + b_ref[...]
    o_ref[...] = out.astype(o_ref.dtype)


def _pick_tiling(c4, c2, n, in_bytes, out_bytes, w_bytes):
    """Choose (col_tile, vmem_limit_bytes) from channel count and VMEM size."""
    try:
        cap = int(getattr(pltpu.get_tpu_info(), "vmem_capacity_bytes", 0) or 0)
    except Exception:  # pragma: no cover - conservative fallback
        cap = 0
    if cap >= 100 * 1024 * 1024:            # v5e / v6e class: 128 MiB VMEM
        vmem_limit = 96 * 1024 * 1024
        tile_budget = 56 * 1024 * 1024
    else:                                   # v7x (64 MiB physical) or unknown
        vmem_limit = 48 * 1024 * 1024
        tile_budget = 26 * 1024 * 1024

    if n <= 256:
        return n, vmem_limit                # single full-extent block

    fixed = 2 * c2 * c4 * w_bytes + 8 * c2 * 4          # weight (2 bufs) + rowsum/bias
    per_col = (2 * c4 * in_bytes                        # x block, double-buffered
               + 2 * c2 * out_bytes                     # out block, double-buffered
               + 2 * c4 * 4 + 3 * c2 * 4)               # in-kernel f32 temporaries
    t = (tile_budget - fixed) // per_col
    t = int(max(256, min(2048, (t // 128) * 128)))
    t = min(t, (n // 128) * 128)                        # block must fit inside n
    if -(-n // t) < 2:                                  # >=2 steps: v7x has 2 TCs
        t = max(128, -(-((n + 1) // 2) // 128) * 128)
    return int(t), vmem_limit


def _fused_reduce(xcat, w_g, rowsum, bias, *, col_tile, vmem_limit, out_dtype):
    c4, n = xcat.shape
    c2 = w_g.shape[0]
    grid = (pl.cdiv(n, col_tile),)

    flops = 2 * c2 * c4 * n
    bytes_accessed = (xcat.size * xcat.dtype.itemsize
                      + w_g.size * w_g.dtype.itemsize
                      + (rowsum.size + bias.size) * 4
                      + c2 * n * jnp.dtype(out_dtype).itemsize)

    return pl.pallas_call(
        _patch_merge_kernel,
        out_shape=jax.ShapeDtypeStruct((c2, n), out_dtype),
        grid=grid,
        in_specs=[
            pl.BlockSpec((c4, col_tile), lambda j: (0, j)),   # stacked activations
            pl.BlockSpec((c2, c4), lambda j: (0, 0)),          # folded weight (grid-invariant)
            pl.BlockSpec((c2, 1), lambda j: (0, 0)),           # rowsum(W*gamma), f32
            pl.BlockSpec((c2, 1), lambda j: (0, 0)),           # W @ beta, f32
        ],
        out_specs=pl.BlockSpec((c2, col_tile), lambda j: (0, j)),
        compiler_params=pltpu.CompilerParams(
            dimension_semantics=("parallel",),
            vmem_limit_bytes=vmem_limit,
        ),
        cost_estimate=pl.CostEstimate(
            flops=flops, transcendentals=n, bytes_accessed=bytes_accessed),
    )(xcat, w_g, rowsum, bias)


def patch_merging_2d(x, weight, gamma, beta, *, col_tile=None):
    """Equivalent of PatchMerging2D.forward.

    x      : [c, h, w]
    weight : [2c, 4c]   (nn.Linear(4c, 2c, bias=False).weight layout)
    gamma  : [4c]       (LayerNorm weight)
    beta   : [4c]       (LayerNorm bias)
    returns: [2c, h//2, w//2]
    """
    assert x.ndim == 3, "PatchMerging2D only accepts [c, h, w] tensors"
    c, h, w = x.shape
    h_out, w_out = h // 2, w // 2
    assert h_out > 0 and w_out > 0, "PatchMerging2D needs h >= 2 and w >= 2"
    hc, wc = 2 * h_out, 2 * w_out
    n = h_out * w_out
    c2, c4 = 2 * c, 4 * c

    # 2x2 strided patch gather, channels-first, stacked into ONE [4c, n] operand.
    # XLA fuses the four strided slices + concat into a single pass over x.
    x0 = x[:, 0:hc:2, 0:wc:2].reshape(c, n)
    x1 = x[:, 1:hc + 1:2, 0:wc:2].reshape(c, n)
    x2 = x[:, 0:hc:2, 1:wc + 1:2].reshape(c, n)
    x3 = x[:, 1:hc + 1:2, 1:wc + 1:2].reshape(c, n)
    xcat = jnp.concatenate([x0, x1, x2, x3], axis=0)            # [4c, n]

    # Fold the LayerNorm affine + normalization into the reduction matmul.
    cdtype = x.dtype
    w_gamma32 = weight.astype(jnp.float32) * gamma.astype(jnp.float32)[None, :]
    w_g = w_gamma32.astype(cdtype)                               # [2c, 4c] MXU operand
    rowsum = jnp.sum(w_g.astype(jnp.float32), axis=1, keepdims=True)        # [2c, 1] f32
    bias = (weight.astype(jnp.float32) @ beta.astype(jnp.float32)).reshape(c2, 1)

    in_b = jnp.dtype(cdtype).itemsize
    if col_tile is None:
        col_tile, vmem_limit = _pick_tiling(c4, c2, n, in_b, in_b, in_b)
    else:
        vmem_limit = 48 * 1024 * 1024
        if n <= 256:
            col_tile = n
        else:
            col_tile = int(col_tile)
            col_tile = max(128, (col_tile // 128) * 128)
            col_tile = min(col_tile, (n // 128) * 128)

    out_flat = _fused_reduce(xcat, w_g, rowsum, bias,
                             col_tile=col_tile, vmem_limit=vmem_limit,
                             out_dtype=x.dtype)                  # [2c, n]
    return out_flat.reshape(c2, h_out, w_out)


if __name__ == "__main__":
    # Small deterministic example; odd h/w exercise the crop path and the
    # non-divisible token count exercises the masked partial last block.
    dim, h, w = 4, 33, 47
    key = jax.random.PRNGKey(0)
    kx, kw, kg, kb = jax.random.split(key, 4)

    x = jax.random.normal(kx, (dim, h, w), dtype=jnp.float32)
    weight = jax.random.normal(kw, (2 * dim, 4 * dim), dtype=jnp.float32) * 0.1
    gamma = 1.0 + 0.1 * jax.random.normal(kg, (4 * dim,), dtype=jnp.float32)
    beta = 0.1 * jax.random.normal(kb, (4 * dim,), dtype=jnp.float32)

    fn = jax.jit(patch_merging_2d, static_argnames=("col_tile",))
    out = fn(x, weight, gamma, beta)
    out = jax.block_until_ready(out)

    h_out, w_out = h // 2, w // 2
    assert out.shape == (2 * dim, h_out, w_out), out.shape

    # Pure-JAX reference (mirrors the PyTorch forward exactly).
    hc, wc = h_out * 2, w_out * 2
    r0 = x[:, 0:hc:2, 0:wc:2]
    r1 = x[:, 1:hc + 1:2, 0:wc:2]
    r2 = x[:, 0:hc:2, 1:wc + 1:2]
    r3 = x[:, 1:hc + 1:2, 1:wc + 1:2]
    xr = jnp.transpose(jnp.concatenate([r0, r1, r2, r3], 0), (1, 2, 0))  # [ho, wo, 4c]
    mu = jnp.mean(xr, -1, keepdims=True)
    var = jnp.mean((xr - mu) ** 2, -1, keepdims=True)
    xn = (xr - mu) / jnp.sqrt(var + 1e-5) * gamma + beta
    ref = jnp.transpose(xn @ weight.T, (2, 0, 1))

    err = float(jnp.max(jnp.abs(out - ref)))
    assert jnp.allclose(out, ref, atol=1e-4, rtol=1e-4), err
    print("KERNEL_OK")
</pallas_src>

<mosaic_0001>
module attributes {stable_mosaic.version = 11 : i64} {
  func.func @_patch_merge_kernel(%arg0: i32, %arg1: memref<16x256xf32, #tpu.memory_space<vmem>>, %arg2: memref<8x16xf32, #tpu.memory_space<vmem>>, %arg3: memref<8x1xf32, #tpu.memory_space<vmem>>, %arg4: memref<8x1xf32, #tpu.memory_space<vmem>>, %arg5: memref<8x256xf32, #tpu.memory_space<vmem>>) attributes {dimension_semantics = [#tpu.dimension_semantics<parallel>], iteration_bounds = array<i64: 2>, scalar_prefetch = 0 : i64, scratch_operands = 0 : i64, tpu.core_type = #tpu.core_type<tc>, window_params = [{transform_indices = @transform_0, window_bounds = array<i64: 16, 256>}, {pipeline_mode = #tpu.pipeline_mode<synchronous>, transform_indices = @transform_1, window_bounds = array<i64: 8, 16>}, {pipeline_mode = #tpu.pipeline_mode<synchronous>, transform_indices = @transform_2, window_bounds = array<i64: 8, 1>}, {pipeline_mode = #tpu.pipeline_mode<synchronous>, transform_indices = @transform_3, window_bounds = array<i64: 8, 1>}, {transform_indices = @transform_4, window_bounds = array<i64: 8, 256>}]} {
    %c0 = arith.constant 0 : index
    %c0_0 = arith.constant 0 : index
    %0 = vector.load %arg1[%c0, %c0_0] : memref<16x256xf32, #tpu.memory_space<vmem>>, vector<16x256xf32>
    %cst = arith.constant dense<0.000000e+00> : vector<256xf32>
    %1 = vector.multi_reduction <add>, %0, %cst [0] : vector<16x256xf32> to vector<256xf32>
    %2 = vector.shape_cast %1 : vector<256xf32> to vector<1x256xf32>
    %cst_1 = arith.constant 6.250000e-02 : f32
    %3 = vector.broadcast %cst_1 : f32 to vector<1x256xf32>
    %4 = arith.mulf %2, %3 : vector<1x256xf32>
    %5 = arith.mulf %0, %0 : vector<16x256xf32>
    %cst_2 = arith.constant dense<0.000000e+00> : vector<256xf32>
    %6 = vector.multi_reduction <add>, %5, %cst_2 [0] : vector<16x256xf32> to vector<256xf32>
    %7 = vector.shape_cast %6 : vector<256xf32> to vector<1x256xf32>
    %cst_3 = arith.constant 6.250000e-02 : f32
    %8 = vector.broadcast %cst_3 : f32 to vector<1x256xf32>
    %9 = arith.mulf %7, %8 : vector<1x256xf32>
    %10 = arith.mulf %4, %4 : vector<1x256xf32>
    %11 = arith.subf %9, %10 : vector<1x256xf32>
    %cst_4 = arith.constant 9.99999974E-6 : f32
    %12 = vector.broadcast %cst_4 : f32 to vector<1x256xf32>
    %13 = arith.addf %11, %12 : vector<1x256xf32>
    %14 = math.rsqrt %13 : vector<1x256xf32>
    %c0_5 = arith.constant 0 : index
    %c0_6 = arith.constant 0 : index
    %15 = vector.load %arg2[%c0_5, %c0_6] : memref<8x16xf32, #tpu.memory_space<vmem>>, vector<8x16xf32>
    %cst_7 = arith.constant dense<0.000000e+00> : vector<8x256xf32>
    %16 = tpu.matmul %15, %0, %cst_7 {dimension_numbers = #tpu.dot_dimension_numbers<[1], [0], [0], [1], [0, 0, 1, 1], [], []>} : vector<8x16xf32>, vector<16x256xf32>, vector<8x256xf32> -> vector<8x256xf32>
    %c0_8 = arith.constant 0 : index
    %c0_9 = arith.constant 0 : index
    %17 = vector.load %arg3[%c0_8, %c0_9] : memref<8x1xf32, #tpu.memory_space<vmem>>, vector<8x1xf32>
    %18 = vector.broadcast %17 : vector<8x1xf32> to vector<8x256xf32>
    %19 = vector.broadcast %4 : vector<1x256xf32> to vector<8x256xf32>
    %20 = arith.mulf %18, %19 : vector<8x256xf32>
    %21 = arith.subf %16, %20 : vector<8x256xf32>
    %22 = vector.broadcast %14 : vector<1x256xf32> to vector<8x256xf32>
    %23 = arith.mulf %21, %22 : vector<8x256xf32>
    %c0_10 = arith.constant 0 : index
    %c0_11 = arith.constant 0 : index
    %24 = vector.load %arg4[%c0_10, %c0_11] : memref<8x1xf32, #tpu.memory_space<vmem>>, vector<8x1xf32>
    %25 = vector.broadcast %24 : vector<8x1xf32> to vector<8x256xf32>
    %26 = arith.addf %23, %25 : vector<8x256xf32>
    %c0_12 = arith.constant 0 : index
    %c0_13 = arith.constant 0 : index
    %27 = vector.load %arg5[%c0_12, %c0_13] : memref<8x256xf32, #tpu.memory_space<vmem>>, vector<8x256xf32>
    tpu.vector_store %arg5[%c0_12, %c0_13], %26 {strides = array<i32>} : memref<8x256xf32, #tpu.memory_space<vmem>>, vector<8x256xf32>,
    return
  }
  func.func @transform_0(%arg0: i32) -> (i32, i32) {
    %c0_i32 = arith.constant 0 : i32
    %c0_i32_0 = arith.constant 0 : i32
    return %c0_i32, %arg0 : i32, i32
  }
  func.func @transform_1(%arg0: i32) -> (i32, i32) {
    %c0_i32 = arith.constant 0 : i32
    %c0_i32_0 = arith.constant 0 : i32
    %c0_i32_1 = arith.constant 0 : i32
    return %c0_i32, %c0_i32_0 : i32, i32
  }
  func.func @transform_2(%arg0: i32) -> (i32, i32) {
    %c0_i32 = arith.constant 0 : i32
    %c0_i32_0 = arith.constant 0 : i32
    %c0_i32_1 = arith.constant 0 : i32
    return %c0_i32, %c0_i32_0 : i32, i32
  }
  func.func @transform_3(%arg0: i32) -> (i32, i32) {
    %c0_i32 = arith.constant 0 : i32
    %c0_i32_0 = arith.constant 0 : i32
    %c0_i32_1 = arith.constant 0 : i32
    return %c0_i32, %c0_i32_0 : i32, i32
  }
  func.func @transform_4(%arg0: i32) -> (i32, i32) {
    %c0_i32 = arith.constant 0 : i32
    %c0_i32_0 = arith.constant 0 : i32
    return %c0_i32, %arg0 : i32, i32
  }
}

</mosaic_0001>

<bundles_post_ra>
// kernel: patch_merging_2d.1
= control target key start
LH: loop header
LB: loop body
LE: loop exit
PB: predicated region body
PF: predicated region fallthrough
CT: control target
= control target key end

     0   :  { %s2081_s15 = smov 0   ;;  %s2083_s16 = smov 0   ;;  %s2854_s0 = inlined_call_operand.vmem [shape: f32[16,368], index: 0, kind: input, shape index: {}]   ;;  %s2855_s1 = inlined_call_operand.vmem [shape: f32[8,16], index: 1, kind: input, shape index: {}]   ;;  %s2856_s2 = inlined_call_operand.vmem [shape: f32[8,1], index: 2, kind: input, shape index: {}]   ;;  %s2857_s3 = inlined_call_operand.vmem [shape: f32[8,1], index: 3, kind: input, shape index: {}]   ;;  %s2858_s4 = inlined_call_operand.vmem [shape: f32[8,368], index: 4, kind: output, shape index: {}]  }
   0x1   :  { %s2085_s17 = smov 0  }
   0x2 LB: > { %s2097_s18 = sadd.s32 4294967295, %s1920_s17   ;;  %s2100_s19 = sadd.s32 1, %s1920_s17   ;;  %s1920_s17 = sphi %s2085_s17, %s2882_s17   ;;  %s1916_s16 = sphi %s2083_s16, %s2881_s16   ;;  %s1912_s15 = sphi %s2081_s15, %s2880_s15  }
   0x3   : > { %s18_s20 = ssub.s32 %s1920_s17, %s2100_s19  ;;  %s21_s21 = sadd.s32 1, %s1916_s16 }
   0x4   : > { %p19_p0 = scmp.eq.s32.totalorder %s18_s20, 0  ;;  %p28_p1 = scmp.ne.s32.totalorder %s1916_s16, %s1912_s15 }
   0x5   : > { %p29_p2 = scmp.eq.s32.totalorder %s1920_s17, 0  ;;  %p121_p3 = scmp.eq.s32.totalorder %s2097_s18, 1 }
   0x6   : > { %s2110_s22 = scalar_select %p19_p0, %s1916_s16, %s21_s21  }
   0x7   : > { %p30_p4 = por %p29_p2, %p28_p1  ;;  %p2112_p5 = por %p121_p3, %p28_p1 }
   0x8   : > { %p1404_p6 = scmp.ge.s32.totalorder %s1920_s17, 2 }
   0xa   : > { %152 = sbr.rel (%p1404_p6) target bundleno = 161 (0xa1), region = 28 }
  0x11   : > { %155 = sbr.rel (!%p30_p4) target bundleno = 161 (0xa1), region = 32  ;;  %s157_s24 = sand.u32 (%p30_p4), 1, %s1916_s16  }
  0x12   : > { %s1406_s25 = sshll.u32 (%p30_p4), %s1920_s17, 1  ;;  %s1405_s26 = sshll.u32 (%p30_p4), %s157_s24, 5 }
  0x13   : > { %s161_s27 = ssub.s32 (%p30_p4), 3, %s1406_s25  ;;  %s1465_s28 = sshll.u32 (%p30_p4), %s1920_s17, 4 }
  0x14   : > { %p162_p7 = scmp.lt.s32.totalorder (%p30_p4), %s161_s27, 2  ;;  %s2123_s5 = scalar_lea.vmem (%p30_p4), %s2854_s0, %s1465_s28  }
  0x15   : > { %s2127_s8 = scalar_lea.vmem (%p30_p4), [#allocation2], %s1405_s26  }
  0x18   : > { %s2884_s27 = smov (!%p162_p7, %s161_s27), 2 }
  0x19   : > { %s1407_s6 = sshll.u32 %s2884_s27, 8  ;;  %s2125_s7 = sshll.u32 %s2884_s27, 3 }
  0x1a   : > { %p1411_p8 = scmp.eq.s32.totalorder %s1407_s6, 0 }
  0x1b   : > { %p172_p9 = scmp.lt.u32.totalorder (!%p1411_p8), %s2125_s7, 8 }
  0x1c   : > { %171 = sbr.rel (%p1411_p8) target bundleno = 161 (0xa1), region = 36 }
  0x23   : > { %175 = sbr.rel (%p172_p9) target bundleno = 152 (0x98), region = 40  ;;  %s2131_s9 = sand.u32 (!%p172_p9), 7, %s2125_s7  }
  0x24   : > { %p193_p10 = scmp.eq.s32.totalorder (!%p172_p9), %s2131_s9, 0  ;;  %p1412_p11 = scmp.ne.s32.totalorder (!%p172_p9), %s2131_s9, 0 }
  0x2a   : > { %196 = sbr.rel (%p1412_p11) target bundleno = 95 (0x5f), region = 55  ;;  %s197_s10 = sshrl.u32 (!%p1412_p11), %s2125_s7, 3 }
  0x2b   : > { %s2138_s11 = sshrl.u32 (!%p1412_p11), %s197_s10, 5 }
  0x2c   : > { %p1413_p12 = scmp.le.s32.totalorder (!%p1412_p11), %s2138_s11, 0 }
  0x31   : > { %1274 = sbr.rel (%p1413_p12) target bundleno = 75 (0x4b), region = 233  ;;  %s2860_s12 = smov (!%p1413_p12), %s2127_s8 }
  0x32   : > { %s2861_s13 = smov (!%p1413_p12), %s2123_s5  ;;  %s2147_s14 = smov (!%p1413_p12), 0  }
  0x33   : > { %s2149_s20 = smov (!%p1413_p12), 0  }
  0x38 LB: >> { %v216_v0 = vld [vmem:[%s1928_s13 + $0x18] sm:$0xff]  ;;  %v218_v1 = vld [vmem:[%s1928_s13 + $0x20] sm:$0xff]  ;;  %v220_v2 = vld [vmem:[%s1928_s13 + $0x28] sm:$0xff]  ;;  %s338_s21 = sadd.s32 1, %s1932_s14  ;;  %s204_s20 = sadd.s32 1, %s1936_s20   ;;  %s1936_s20 = sphi %s2149_s20, %s204_s20   ;;  %s1932_s14 = sphi %s2147_s14, %s2864_s14   ;;  %s1928_s13 = sphi %s2861_s13, %s2863_s13   ;;  %s1924_s12 = sphi %s2860_s12, %s2862_s12  }
  0x39   : >> { %v222_v3 = vld [vmem:[%s1928_s13 + $0x30] sm:$0xff]  ;;  %v224_v4 = vld [vmem:[%s1928_s13 + $0x38] sm:$0xff]  ;;  %v226_v5 = vld [vmem:[%s1928_s13 + $0x40] sm:$0xff]  ;;  %275 = vst [vmem:[%s1924_s12 + $0x10] sm:$0xff] %v216_v0  ;;  %p339_p13 = scmp.ge.s32.totalorder %s338_s21, %s2138_s11  ;;  %p203_p0 = scmp.ge.s32.totalorder %s204_s20, %s2138_s11 }
  0x3a   : >> { %277 = vst [vmem:[%s1924_s12 + $0x18] sm:$0xff] %v218_v1  ;;  %279 = vst [vmem:[%s1924_s12 + $0x20] sm:$0xff] %v220_v2  ;;  %v228_v6 = vld [vmem:[%s1928_s13 + $0x48] sm:$0xff]  ;;  %v230_v7 = vld [vmem:[%s1928_s13 + $0x50] sm:$0xff] }
  0x3b   : >> { %v232_v8 = vld [vmem:[%s1928_s13 + $0x58] sm:$0xff]  ;;  %281 = vst [vmem:[%s1924_s12 + $0x28] sm:$0xff] %v222_v3  ;;  %283 = vst [vmem:[%s1924_s12 + $0x30] sm:$0xff] %v224_v4  ;;  %v234_v9 = vld [vmem:[%s1928_s13 + $0x60] sm:$0xff]  ;;  %s2886_s21 = smov (%p339_p13, %s338_s21), 0 }
  0x3c   : >> { %285 = vst [vmem:[%s1924_s12 + $0x38] sm:$0xff] %v226_v5  ;;  %v236_v10 = vld [vmem:[%s1928_s13 + $0x68] sm:$0xff]  ;;  %v238_v11 = vld [vmem:[%s1928_s13 + $0x70] sm:$0xff]  ;;  %287 = vst [vmem:[%s1924_s12 + $0x40] sm:$0xff] %v228_v6  ;;  %s1414_s24 = sshll.u32 %s2886_s21, 8  ;;  %s2864_s14 = smov %s2886_s21 }
  0x3d   : >> { %289 = vst [vmem:[%s1924_s12 + $0x48] sm:$0xff] %v230_v7  ;;  %291 = vst [vmem:[%s1924_s12 + $0x50] sm:$0xff] %v232_v8  ;;  %v240_v12 = vld [vmem:[%s1928_s13 + $0x78] sm:$0xff]  ;;  %v242_v13 = vld [vmem:[%s1928_s13 + $0x80] sm:$0xff]  ;;  %s343_s25 = scalar_lea.vmem %s2123_s5, %s1414_s24   ;;  %s344_s26 = scalar_lea.vmem %s2127_s8, %s1414_s24 [#allocation2]  }
  0x3e   : >> { %v244_v14 = vld [vmem:[%s1928_s13 + $0x88] sm:$0xff]  ;;  %293 = vst [vmem:[%s1924_s12 + $0x58] sm:$0xff] %v234_v9  ;;  %295 = vst [vmem:[%s1924_s12 + $0x60] sm:$0xff] %v236_v10  ;;  %v246_v15 = vld [vmem:[%s1928_s13 + $0x90] sm:$0xff] }
  0x3f   : >> { %297 = vst [vmem:[%s1924_s12 + $0x68] sm:$0xff] %v238_v11  ;;  %v248_v16 = vld [vmem:[%s1928_s13 + $0x98] sm:$0xff]  ;;  %v250_v17 = vld [vmem:[%s1928_s13 + $0xa0] sm:$0xff]  ;;  %299 = vst [vmem:[%s1924_s12 + $0x70] sm:$0xff] %v240_v12 }
  0x40   : >> { %301 = vst [vmem:[%s1924_s12 + $0x78] sm:$0xff] %v242_v13  ;;  %303 = vst [vmem:[%s1924_s12 + $0x80] sm:$0xff] %v244_v14  ;;  %v252_v18 = vld [vmem:[%s1928_s13 + $0xa8] sm:$0xff]  ;;  %v254_v19 = vld [vmem:[%s1928_s13 + $0xb0] sm:$0xff] }
  0x41   : >> { %v256_v20 = vld [vmem:[%s1928_s13 + $0xb8] sm:$0xff]  ;;  %305 = vst [vmem:[%s1924_s12 + $0x88] sm:$0xff] %v246_v15  ;;  %307 = vst [vmem:[%s1924_s12 + $0x90] sm:$0xff] %v248_v16  ;;  %v258_v21 = vld [vmem:[%s1928_s13 + $0xc0] sm:$0xff] }
  0x42   : >> { %309 = vst [vmem:[%s1924_s12 + $0x98] sm:$0xff] %v250_v17  ;;  %v260_v22 = vld [vmem:[%s1928_s13 + $0xc8] sm:$0xff]  ;;  %v262_v23 = vld [vmem:[%s1928_s13 + $0xd0] sm:$0xff]  ;;  %311 = vst [vmem:[%s1924_s12 + $0xa0] sm:$0xff] %v252_v18 }
  0x43   : >> { %313 = vst [vmem:[%s1924_s12 + $0xa8] sm:$0xff] %v254_v19  ;;  %315 = vst [vmem:[%s1924_s12 + $0xb0] sm:$0xff] %v256_v20  ;;  %v264_v24 = vld [vmem:[%s1928_s13 + $0xd8] sm:$0xff]  ;;  %v266_v25 = vld [vmem:[%s1928_s13 + $0xe0] sm:$0xff] }
  0x44   : >> { %v268_v26 = vld [vmem:[%s1928_s13 + $0xe8] sm:$0xff]  ;;  %317 = vst [vmem:[%s1924_s12 + $0xb8] sm:$0xff] %v258_v21  ;;  %319 = vst [vmem:[%s1924_s12 + $0xc0] sm:$0xff] %v260_v22  ;;  %v270_v27 = vld [vmem:[%s1928_s13 + $0xf0] sm:$0xff]  ;;  %206 = sbr.rel (!%p203_p0) target bundleno = 56 (0x38), region = 239 }
  0x45   : >> { %321 = vst [vmem:[%s1924_s12 + $0xc8] sm:$0xff] %v262_v23  ;;  %v272_v28 = vld [vmem:[%s1928_s13 + $0xf8] sm:$0xff]  ;;  %v210_v29 = vld [vmem:[%s1928_s13] sm:$0xff]  ;;  %323 = vst [vmem:[%s1924_s12 + $0xd0] sm:$0xff] %v264_v24 }
  0x46   : >> { %325 = vst [vmem:[%s1924_s12 + $0xd8] sm:$0xff] %v266_v25  ;;  %327 = vst [vmem:[%s1924_s12 + $0xe0] sm:$0xff] %v268_v26  ;;  %v212_v30 = vld [vmem:[%s1928_s13 + $0x8] sm:$0xff]  ;;  %v332_v31 = vld [vmem:[%s1928_s13 + $0x100] sm:$0xff] }
  0x47   : >> { %211 = vst [vmem:[%s1924_s12] sm:$0xff] %v210_v29  ;;  %329 = vst [vmem:[%s1924_s12 + $0xe8] sm:$0xff] %v270_v27  ;;  %v334_v32 = vld [vmem:[%s1928_s13 + $0x108] sm:$0xff]  ;;  %v336_v33 = vld [vmem:[%s1928_s13 + $0x110] sm:$0xff]  ;;  %s2863_s13 = smov %s343_s25 }
  0x48   : >> { %331 = vst [vmem:[%s1924_s12 + $0xf0] sm:$0xff] %v272_v28  ;;  %213 = vst [vmem:[%s1924_s12 + $0x8] sm:$0xff] %v212_v30 }
  0x49   : >> { %333 = vst [vmem:[%s1924_s12 + $0xf8] sm:$0xff] %v332_v31  ;;  %335 = vst [vmem:[%s1924_s12 + $0x100] sm:$0xff] %v334_v32 }
  0x4a   : >> { %337 = vst [vmem:[%s1924_s12 + $0x108] sm:$0xff] %v336_v33  ;;  %s2862_s12 = smov %s344_s26 }
  0x4b PF: > { %s2251_s27 = sand.u32 31, %s197_s10   ;;  %s1466_s28 = sshll.u32 %s2138_s11, 12 }
  0x4c   : > { %s349_s29 = sshra.s32 %s1466_s28, 4  ;;  %p1419_p1 = scmp.le.s32.totalorder %s2251_s27, 0 }
  0x4d   : > { %s2255_s30 = scalar_lea.vmem %s2123_s5, %s349_s29   ;;  %s353_s6 = scalar_lea.vmem %s2127_s8, %s349_s29 [#allocation2]  }
  0x4e   : > { %1288 = sbr.rel (%p1419_p1) target bundleno = 95 (0x5f), region = 244  ;;  %s1938_s21 = smov (!%p1419_p1), %s353_s6  }
  0x4f   : > { %s1942_s20 = smov (!%p1419_p1), %s2255_s30   ;;  %s1946_s24 = smov (!%p1419_p1), 0  }
  0x50   : > { %s1950_s12 = smov (!%p1419_p1), 0  }
  0x55 LB: >> { %v365_v34 = vld [vmem:[%s1944_s20] sm:$0xff]  ;;  %v367_v35 = vld [vmem:[%s1944_s20 + $0x18] sm:$0xff]  ;;  %s369_s10 = sadd.s32 1, %s1948_s24  ;;  %s359_s12 = sadd.s32 1, %s1952_s12   ;;  %s1952_s12 = sphi %s1950_s12, %s359_s12   ;;  %s1948_s24 = sphi %s1946_s24, %s1947_s24   ;;  %s1944_s20 = sphi %s1942_s20, %s374_s20   ;;  %s1940_s21 = sphi %s1938_s21, %s375_s21  }
  0x56   : >> { %366 = vst [vmem:[%s1940_s21] sm:$0xff] %v365_v34  ;;  %368 = vst [vmem:[%s1940_s21 + $0x10] sm:$0xff] %v367_v35  ;;  %p370_p2 = scmp.ge.s32.totalorder %s369_s10, %s2251_s27  ;;  %p358_p3 = scmp.ge.s32.totalorder %s359_s12, %s2251_s27 }
  0x58   : >> { %s2888_s10 = smov (%p370_p2, %s369_s10), 0  ;;  %361 = sbr.rel (!%p358_p3) target bundleno = 85 (0x55), region = 250 }
  0x59   : >> { %s1420_s11 = sshll.u32 %s2888_s10, 3  ;;  %s1947_s24 = smov %s2888_s10  }
  0x5a   : >> { %s374_s20 = scalar_lea.vmem %s2255_s30, %s1420_s11   ;;  %s375_s21 = scalar_lea.vmem %s353_s6, %s1420_s11 [#allocation2]  }
  0x5f PF: > { %378 = sbr.rel (%p193_p10) target bundleno = 152 (0x98), region = 73  ;;  %s380_s13 = ssub.s32 (!%p193_p10), %s2125_s7, %s2131_s9 }
  0x60   : > { %s384_s14 = sshrl.u32 (!%p193_p10), %s2125_s7, 3  ;;  %s2269_s25 = scalar_lea.vmem (!%p193_p10), %s2123_s5, %s380_s13 }
  0x61   : > { %s2272_s26 = scalar_lea.vmem (!%p193_p10), %s2127_s8, %s380_s13 [#allocation2]  ;;  %s2276_s28 = sshrl.u32 (!%p193_p10), %s384_s14, 5 }
  0x62   : > { %p1422_p4 = scmp.le.s32.totalorder (!%p193_p10), %s2276_s28, 0 }
  0x66   : > { %1302 = sbr.rel (%p1422_p4) target bundleno = 128 (0x80), region = 255  ;;  %s2865_s27 = smov (!%p1422_p4), %s2127_s8 }
  0x67   : > { %s2866_s29 = smov (!%p1422_p4), %s2123_s5  ;;  %s2285_s30 = smov (!%p1422_p4), 0  }
  0x68   : > { %s2287_s6 = smov (!%p1422_p4), 0  }
  0x6d LB: >> { %v403_v36 = vld [vmem:[%s1960_s29 + $0x18] sm:$0xff]  ;;  %v405_v37 = vld [vmem:[%s1960_s29 + $0x20] sm:$0xff]  ;;  %v407_v38 = vld [vmem:[%s1960_s29 + $0x28] sm:$0xff]  ;;  %s525_s21 = sadd.s32 1, %s1964_s30  ;;  %s391_s6 = sadd.s32 1, %s1968_s6   ;;  %s1968_s6 = sphi %s2287_s6, %s391_s6   ;;  %s1964_s30 = sphi %s2285_s30, %s2869_s30   ;;  %s1960_s29 = sphi %s2866_s29, %s2868_s29   ;;  %s1956_s27 = sphi %s2865_s27, %s2867_s27  }
  0x6e   : >> { %v409_v39 = vld [vmem:[%s1960_s29 + $0x30] sm:$0xff]  ;;  %v411_v40 = vld [vmem:[%s1960_s29 + $0x38] sm:$0xff]  ;;  %v413_v41 = vld [vmem:[%s1960_s29 + $0x40] sm:$0xff]  ;;  %462 = vst [vmem:[%s1956_s27 + $0x10] sm:$0xff] %v403_v36  ;;  %p526_p6 = scmp.ge.s32.totalorder %s525_s21, %s2276_s28  ;;  %p390_p7 = scmp.ge.s32.totalorder %s391_s6, %s2276_s28 }
  0x6f   : >> { %464 = vst [vmem:[%s1956_s27 + $0x18] sm:$0xff] %v405_v37  ;;  %466 = vst [vmem:[%s1956_s27 + $0x20] sm:$0xff] %v407_v38  ;;  %v415_v42 = vld [vmem:[%s1960_s29 + $0x48] sm:$0xff]  ;;  %v417_v43 = vld [vmem:[%s1960_s29 + $0x50] sm:$0xff] }
  0x70   : >> { %v419_v44 = vld [vmem:[%s1960_s29 + $0x58] sm:$0xff]  ;;  %468 = vst [vmem:[%s1956_s27 + $0x28] sm:$0xff] %v409_v39  ;;  %470 = vst [vmem:[%s1956_s27 + $0x30] sm:$0xff] %v411_v40  ;;  %v421_v45 = vld [vmem:[%s1960_s29 + $0x60] sm:$0xff]  ;;  %s2890_s21 = smov (%p526_p6, %s525_s21), 0 }
  0x71   : >> { %472 = vst [vmem:[%s1956_s27 + $0x38] sm:$0xff] %v413_v41  ;;  %v423_v46 = vld [vmem:[%s1960_s29 + $0x68] sm:$0xff]  ;;  %v425_v47 = vld [vmem:[%s1960_s29 + $0x70] sm:$0xff]  ;;  %474 = vst [vmem:[%s1956_s27 + $0x40] sm:$0xff] %v415_v42  ;;  %s1423_s20 = sshll.u32 %s2890_s21, 8  ;;  %s2869_s30 = smov %s2890_s21 }
  0x72   : >> { %476 = vst [vmem:[%s1956_s27 + $0x48] sm:$0xff] %v417_v43  ;;  %478 = vst [vmem:[%s1956_s27 + $0x50] sm:$0xff] %v419_v44  ;;  %v427_v48 = vld [vmem:[%s1960_s29 + $0x78] sm:$0xff]  ;;  %v429_v49 = vld [vmem:[%s1960_s29 + $0x80] sm:$0xff]  ;;  %s530_s24 = scalar_lea.vmem %s2123_s5, %s1423_s20   ;;  %s531_s12 = scalar_lea.vmem %s2127_s8, %s1423_s20 [#allocation2]  }
  0x73   : >> { %v431_v50 = vld [vmem:[%s1960_s29 + $0x88] sm:$0xff]  ;;  %480 = vst [vmem:[%s1956_s27 + $0x58] sm:$0xff] %v421_v45  ;;  %482 = vst [vmem:[%s1956_s27 + $0x60] sm:$0xff] %v423_v46  ;;  %v433_v51 = vld [vmem:[%s1960_s29 + $0x90] sm:$0xff] }
  0x74   : >> { %484 = vst [vmem:[%s1956_s27 + $0x68] sm:$0xff] %v425_v47  ;;  %v435_v52 = vld [vmem:[%s1960_s29 + $0x98] sm:$0xff]  ;;  %v437_v53 = vld [vmem:[%s1960_s29 + $0xa0] sm:$0xff]  ;;  %486 = vst [vmem:[%s1956_s27 + $0x70] sm:$0xff] %v427_v48 }
  0x75   : >> { %488 = vst [vmem:[%s1956_s27 + $0x78] sm:$0xff] %v429_v49  ;;  %490 = vst [vmem:[%s1956_s27 + $0x80] sm:$0xff] %v431_v50  ;;  %v439_v54 = vld [vmem:[%s1960_s29 + $0xa8] sm:$0xff]  ;;  %v441_v55 = vld [vmem:[%s1960_s29 + $0xb0] sm:$0xff] }
  0x76   : >> { %v443_v56 = vld [vmem:[%s1960_s29 + $0xb8] sm:$0xff]  ;;  %492 = vst [vmem:[%s1956_s27 + $0x88] sm:$0xff] %v433_v51  ;;  %494 = vst [vmem:[%s1956_s27 + $0x90] sm:$0xff] %v435_v52  ;;  %v445_v57 = vld [vmem:[%s1960_s29 + $0xc0] sm:$0xff] }
  0x77   : >> { %496 = vst [vmem:[%s1956_s27 + $0x98] sm:$0xff] %v437_v53  ;;  %v447_v58 = vld [vmem:[%s1960_s29 + $0xc8] sm:$0xff]  ;;  %v449_v59 = vld [vmem:[%s1960_s29 + $0xd0] sm:$0xff]  ;;  %498 = vst [vmem:[%s1956_s27 + $0xa0] sm:$0xff] %v439_v54 }
  0x78   : >> { %500 = vst [vmem:[%s1956_s27 + $0xa8] sm:$0xff] %v441_v55  ;;  %502 = vst [vmem:[%s1956_s27 + $0xb0] sm:$0xff] %v443_v56  ;;  %v451_v60 = vld [vmem:[%s1960_s29 + $0xd8] sm:$0xff]  ;;  %v453_v61 = vld [vmem:[%s1960_s29 + $0xe0] sm:$0xff] }
  0x79   : >> { %v455_v62 = vld [vmem:[%s1960_s29 + $0xe8] sm:$0xff]  ;;  %504 = vst [vmem:[%s1956_s27 + $0xb8] sm:$0xff] %v445_v57  ;;  %506 = vst [vmem:[%s1956_s27 + $0xc0] sm:$0xff] %v447_v58  ;;  %v457_v63 = vld [vmem:[%s1960_s29 + $0xf0] sm:$0xff]  ;;  %393 = sbr.rel (!%p390_p7) target bundleno = 109 (0x6d), region = 261 }
  0x7a   : >> { %508 = vst [vmem:[%s1956_s27 + $0xc8] sm:$0xff] %v449_v59  ;;  %v459_v0 = vld [vmem:[%s1960_s29 + $0xf8] sm:$0xff]  ;;  %v397_v1 = vld [vmem:[%s1960_s29] sm:$0xff]  ;;  %510 = vst [vmem:[%s1956_s27 + $0xd0] sm:$0xff] %v451_v60 }
  0x7b   : >> { %512 = vst [vmem:[%s1956_s27 + $0xd8] sm:$0xff] %v453_v61  ;;  %514 = vst [vmem:[%s1956_s27 + $0xe0] sm:$0xff] %v455_v62  ;;  %v399_v2 = vld [vmem:[%s1960_s29 + $0x8] sm:$0xff]  ;;  %v519_v3 = vld [vmem:[%s1960_s29 + $0x100] sm:$0xff] }
  0x7c   : >> { %398 = vst [vmem:[%s1956_s27] sm:$0xff] %v397_v1  ;;  %516 = vst [vmem:[%s1956_s27 + $0xe8] sm:$0xff] %v457_v63  ;;  %v521_v4 = vld [vmem:[%s1960_s29 + $0x108] sm:$0xff]  ;;  %v523_v5 = vld [vmem:[%s1960_s29 + $0x110] sm:$0xff]  ;;  %s2868_s29 = smov %s530_s24 }
  0x7d   : >> { %518 = vst [vmem:[%s1956_s27 + $0xf0] sm:$0xff] %v459_v0  ;;  %400 = vst [vmem:[%s1956_s27 + $0x8] sm:$0xff] %v399_v2 }
  0x7e   : >> { %520 = vst [vmem:[%s1956_s27 + $0xf8] sm:$0xff] %v519_v3  ;;  %522 = vst [vmem:[%s1956_s27 + $0x100] sm:$0xff] %v521_v4 }
  0x7f   : >> { %524 = vst [vmem:[%s1956_s27 + $0x108] sm:$0xff] %v523_v5  ;;  %s2867_s27 = smov %s531_s12 }
  0x80 PF: > { %s2389_s10 = sand.u32 31, %s384_s14   ;;  %s1468_s11 = sshll.u32 %s2276_s28, 12 }
  0x81   : > { %s536_s13 = sshra.s32 %s1468_s11, 4  ;;  %p1428_p8 = scmp.le.s32.totalorder %s2389_s10, 0 }
  0x82   : > { %s2393_s20 = scalar_lea.vmem %s2123_s5, %s536_s13   ;;  %s540_s12 = scalar_lea.vmem %s2127_s8, %s536_s13 [#allocation2]  }
  0x83   : > { %1316 = sbr.rel (%p1428_p8) target bundleno = 148 (0x94), region = 266  ;;  %s1970_s21 = smov (!%p1428_p8), %s540_s12  }
  0x84   : > { %s1974_s6 = smov (!%p1428_p8), %s2393_s20   ;;  %s1978_s24 = smov (!%p1428_p8), 0  }
  0x85   : > { %s1982_s27 = smov (!%p1428_p8), 0  }
  0x8a LB: >> { %v552_v6 = vld [vmem:[%s1976_s6] sm:$0xff]  ;;  %v554_v7 = vld [vmem:[%s1976_s6 + $0x18] sm:$0xff]  ;;  %s556_s14 = sadd.s32 1, %s1980_s24  ;;  %s546_s27 = sadd.s32 1, %s1984_s27   ;;  %s1984_s27 = sphi %s1982_s27, %s546_s27   ;;  %s1980_s24 = sphi %s1978_s24, %s1979_s24   ;;  %s1976_s6 = sphi %s1974_s6, %s561_s6   ;;  %s1972_s21 = sphi %s1970_s21, %s562_s21  }
  0x8b   : >> { %553 = vst [vmem:[%s1972_s21] sm:$0xff] %v552_v6  ;;  %555 = vst [vmem:[%s1972_s21 + $0x10] sm:$0xff] %v554_v7  ;;  %p557_p9 = scmp.ge.s32.totalorder %s556_s14, %s2389_s10  ;;  %p545_p10 = scmp.ge.s32.totalorder %s546_s27, %s2389_s10 }
  0x8d   : >> { %s2892_s14 = smov (%p557_p9, %s556_s14), 0  ;;  %548 = sbr.rel (!%p545_p10) target bundleno = 138 (0x8a), region = 272 }
  0x8e   : >> { %s1429_s28 = sshll.u32 %s2892_s14, 3  ;;  %s1979_s24 = smov %s2892_s14  }
  0x8f   : >> { %s561_s6 = scalar_lea.vmem %s2393_s20, %s1429_s28   ;;  %s562_s21 = scalar_lea.vmem %s540_s12, %s1429_s28 [#allocation2]  }
  0x94 PF: > { %s2050_s29 = smov 0  }
  0x95   : > { %s563_s30 = sshllo.u32 %s2050_s29, %s2131_s9 }
  0x96   : > { %v572_v8 = vld [vmem:[%s2269_s25] sm:%s563_s30]  ;;  %v574_v9 = vld [vmem:[%s2269_s25 + $0x18] sm:%s563_s30] }
  0x97   : > { %573 = vst [vmem:[%s2272_s26] sm:%s563_s30] %v572_v8  ;;  %575 = vst [vmem:[%s2272_s26 + $0x10] sm:%s563_s30] %v574_v9 }
  0x98 PF: > { %p1431_p11 = scmp.ge.u32.totalorder %s2125_s7, 8 }
  0x99   : > { %s2051_s11 = smov (!%p1431_p11), 0  }
  0x9a   : > { %178 = sbr.rel (%p1431_p11) target bundleno = 161 (0xa1), region = 44  ;;  %s179_s10 = sshllo.u32 (!%p1431_p11), %s2051_s11, %s2125_s7 }
  0x9b   : > { %v188_v10 = vld [vmem:[%s2123_s5] sm:%s179_s10] (!%p1431_p11)  ;;  %v190_v11 = vld [vmem:[%s2123_s5 + $0x18] sm:%s179_s10] (!%p1431_p11) }
  0x9c   : > { %189 = vst [vmem:[%s2127_s8] sm:%s179_s10] (!%p1431_p11), %v188_v10  ;;  %191 = vst [vmem:[%s2127_s8 + $0x10] sm:%s179_s10] (!%p1431_p11), %v190_v11 }
  0xa1 PF: > { %p1432_p12 = scmp.ge.s32.totalorder %s1920_s17, 1  ;;  %p578_p13 = scmp.lt.s32.totalorder %s1920_s17, 3 }
  0xa3   : > { %p579_p0 = pnand %p1432_p12, %p578_p13 }
  0xa4   : > { %s585_s9 = sand.u32 (!%p579_p0), 1, %s1912_s15   ;;  %v743_v12 = vld [vmem:[%s2856_s2] sm:$0xff] (!%p579_p0)  ;;  %v2052_v13 = vmov (!%p579_p0), 0.0   ;;  %v2053_v14 = vmov (!%p579_p0), 0   ;;  %vm668_vm0 = vcmask (!%p579_p0), 130048  }
  0xa5   : > { %582 = sbr.rel (%p579_p0) target bundleno = 559 (0x22f), region = 98  ;;  %s1433_s5 = sshll.u32 (!%p579_p0), %s585_s9, 5  ;;  %736 = vmatprep.mubr.f32.mxu0 (!%p579_p0), %v2052_v13  ;;  %1765 = vset.pattern.permute.xlu0 (!%p579_p0), %v2053_v14  ;;  %v755_v15 = vld [vmem:[%s2857_s3] sm:$0xff] (!%p579_p0) }
  0xa6   : > { %746 = vperm.xlu0 (!%p579_p0), %1765, %v743_v12   ;;  %s587_s17 = scalar_lea.vmem (!%p579_p0), [#allocation2], %s1433_s5  ;;  %v667_v32 = vld [vmem:[%s2855_s1] sm:$0xff] (!%p579_p0)  ;;  %s1434_s12 = sshll.u32 (!%p579_p0), %s585_s9, 4 }
  0xa7   : > { %v620_v16 = vld [vmem:[%s587_s17 + $0x8] sm:$0xff] (!%p579_p0)  ;;  %v622_v17 = vld [vmem:[%s587_s17 + $0x18] sm:$0xff] (!%p579_p0)  ;;  %v619_v18 = vld [vmem:[%s587_s17] sm:$0xff] (!%p579_p0)  ;;  %s2428_s21 = scalar_lea.vmem (!%p579_p0), [#allocation3], %s1434_s12  }
  0xa8   : > { %v630_v19 = vadd.f32 (!%p579_p0), %v622_v17, %v620_v16  ;;  %v640_v20 = vmul.f32 (!%p579_p0), %v620_v16, %v620_v16  ;;  %v642_v21 = vmul.f32 (!%p579_p0), %v622_v17, %v622_v17  ;;  %v1475_v22 = vpack.c.bf16 (!%p579_p0), %v622_v17, %v620_v16  ;;  %v621_v23 = vld [vmem:[%s587_s17 + $0x10] sm:$0xff] (!%p579_p0) }
  0xa9   : > { %v623_v24 = vadd.f32 (!%p579_p0), %v621_v23, %v619_v18  ;;  %v639_v25 = vmul.f32 (!%p579_p0), %v619_v18, %v619_v18  ;;  %v641_v26 = vmul.f32 (!%p579_p0), %v621_v23, %v621_v23  ;;  %v1477_v27 = vpack.c.bf16 (!%p579_p0), %v621_v23, %v619_v18 }
  0xaa   : > { %v631_v28 = vrot.slane (!%p579_p0), %v630_v19, 4  ;;  %v650_v29 = vadd.f32 (!%p579_p0), %v642_v21, %v640_v20  ;;  %1476 = vmatprep.subr.bf16.mxu0 (!%p579_p0), %v1475_v22  ;;  %758 = vperm.xlu0 (!%p579_p0), %1765, %v755_v15  }
  0xab   : > { %v624_v30 = vrot.slane (!%p579_p0), %v623_v24, 4  ;;  %v643_v31 = vadd.f32 (!%p579_p0), %v641_v26, %v639_v25  ;;  %1478 = vmatpush1.bf16.msra.mxu0 (!%p579_p0), %v1477_v27 }
  0xac   : > { %v632_v33 = vadd.f32 %v631_v28, %v630_v19  ;;  %v651_v34 = vrot.slane %v650_v29, 4  ;;  %s1437_s15 = sshll.u32 (%p2112_p5), %s2097_s18, 1  ;;  %s1470_s6 = sshll.u32 (%p2112_p5), %s2097_s18, 4 }
  0xad   : > { %v625_v35 = vadd.f32 %v624_v30, %v623_v24  ;;  %v644_v36 = vrot.slane %v643_v31, 4  ;;  %s773_s24 = ssub.s32 (%p2112_p5), 3, %s1437_s15  ;;  %s2439_s28 = scalar_lea.vmem (%p2112_p5), %s2858_s4, %s1470_s6  }
  0xae   : > { %v652_v37 = vadd.f32 %v651_v34, %v650_v29  ;;  %1435 = vmatmul.mubr.msk.f32.vlgmr.msra.gmra.mrb[0].mxu0 %vm668_vm0, %v667_v32  ;;  %v633_v38 = vrot.slane %v632_v33, 2  ;;  %p774_p1 = scmp.lt.s32.totalorder (%p2112_p5), %s773_s24, 2 }
  0xaf   : > { %v645_v39 = vadd.f32 %v644_v36, %v643_v31  ;;  %v626_v40 = vrot.slane %v625_v35, 2 }
  0xb0   : > { %v653_v41 = vrot.slane %v652_v37, 2  ;;  %v634_v42 = vadd.f32 %v633_v38, %v632_v33 }
  0xb1   : > { %v646_v43 = vrot.slane %v645_v39, 2  ;;  %v627_v44 = vadd.f32 %v626_v40, %v625_v35 }
  0xb2   : > { %v654_v45 = vadd.f32 %v653_v41, %v652_v37  ;;  %v635_v46 = vrot.slane %v634_v42, 1 }
  0xb3   : > { %v647_v47 = vadd.f32 %v646_v43, %v645_v39  ;;  %v628_v48 = vrot.slane %v627_v44, 1 }
  0xb4   : > { %v636_v49 = vadd.f32 %v635_v46, %v634_v42  ;;  %v655_v50 = vrot.slane %v654_v45, 1 }
  0xb5   : > { %v629_v51 = vadd.f32 %v628_v48, %v627_v44  ;;  %v648_v52 = vrot.slane %v647_v47, 1 }
  0xb6   : > { %v638_v53 = vmul.f32 0.0625, %v636_v49  ;;  %v656_v54 = vadd.f32 %v655_v50, %v654_v45 }
  0xb7   : > { %v637_v55 = vmul.f32 0.0625, %v629_v51  ;;  %v649_v56 = vadd.f32 %v648_v52, %v647_v47 }
  0xb8   : > { %v658_v57 = vmul.f32 0.0625, %v656_v54  ;;  %v660_v58 = vmul.f32 %v638_v53, %v638_v53 }
  0xb9   : > { %v657_v59 = vmul.f32 0.0625, %v649_v56  ;;  %v659_v60 = vmul.f32 %v637_v55, %v637_v55 }
  0xba   : > { %v662_v61 = vsub.f32 %v658_v57, %v660_v58 }
  0xbb   : > { %v661_v62 = vsub.f32 %v657_v59, %v659_v60 }
  0xbc   : > { %v664_v0 = vadd.f32 1e-05, %v662_v61 }
  0xbd   : > { %v663_v63 = vadd.f32 1e-05, %v661_v62 }
  0xbf   : > { %1766 = vrsqrt.f32 %v663_v63 }
  0xc0   : > { %1768 = vrsqrt.f32 %v664_v0 }
  0xc9   : > { %v1767_v4 = vpop.eup %1766 }
  0xca   : > { %v1769_v6 = vpop.eup %1768 }
 0x125   : > { %v747_v1 = vpop.permute.xlu0 %746 }
 0x126   : > { %v749_v2 = vmul.f32 %v747_v1, %v637_v55  ;;  %v750_v3 = vmul.f32 %v747_v1, %v638_v53 }
 0x129   : > { %v759_v11 = vpop.permute.xlu0 %758 }
 0x181   : > { %v738_v5 = vpop.f32.mrb[0].mxu0 }
 0x182   : > { %v751_v7 = vsub.f32 %v738_v5, %v749_v2  ;;  %v740_v8 = vpop.f32.mrb[1].mxu0 }
 0x183   : > { %v752_v9 = vsub.f32 %v740_v8, %v750_v3  ;;  %771 = sbr.rel (!%p2112_p5) target bundleno = 559 (0x22f), region = 106 }
 0x184   : > { %v753_v10 = vmul.f32 %v1767_v4, %v751_v7 }
 0x185   : > { %v754_v12 = vmul.f32 %v1769_v6, %v752_v9 }
 0x186   : > { %v761_v13 = vadd.f32 %v759_v11, %v753_v10 }
 0x187   : > { %v762_v14 = vadd.f32 %v759_v11, %v754_v12 }
 0x188   : > { %763 = vst [vmem:[%s2428_s21] sm:$0xff] %v761_v13 }
 0x189   : > { %764 = vst [vmem:[%s2428_s21 + $0x8] sm:$0xff] %v762_v14 }
 0x18a   : > { %s2894_s24 = smov (!%p774_p1, %s773_s24), 2 }
 0x18b   : > { %s1438_s29 = sshll.u32 %s2894_s24, 7  ;;  %s2441_s30 = sshll.u32 %s2894_s24, 3 }
 0x18c   : > { %p1442_p2 = scmp.eq.s32.totalorder %s1438_s29, 0 }
 0x18d   : > { %p784_p3 = scmp.lt.u32.totalorder (!%p1442_p2), %s2441_s30, 8 }
 0x18e   : > { %783 = sbr.rel (%p1442_p2) target bundleno = 559 (0x22f), region = 110 }
 0x195   : > { %787 = sbr.rel (%p784_p3) target bundleno = 550 (0x226), region = 114  ;;  %s2445_s23 = sand.u32 (!%p784_p3), 7, %s2441_s30  }
 0x196   : > { %p803_p5 = scmp.eq.s32.totalorder (!%p784_p3), %s2445_s23, 0  ;;  %p1443_p4 = scmp.ne.s32.totalorder (!%p784_p3), %s2445_s23, 0 }
 0x19c   : > { %806 = sbr.rel (%p1443_p4) target bundleno = 479 (0x1df), region = 129  ;;  %s807_s18 = sshrl.u32 (!%p1443_p4), %s2441_s30, 3 }
 0x19d   : > { %s2452_s11 = sshrl.u32 (!%p1443_p4), %s807_s18, 6 }
 0x19e   : > { %p1444_p6 = scmp.le.s32.totalorder (!%p1443_p4), %s2452_s11, 0 }
 0x1a3   : > { %1330 = sbr.rel (%p1444_p6) target bundleno = 459 (0x1cb), region = 277  ;;  %s2870_s10 = smov (!%p1444_p6), %s2439_s28 }
 0x1a4   : > { %s2871_s9 = smov (!%p1444_p6), %s2428_s21  ;;  %s2461_s25 = smov (!%p1444_p6), 0  }
 0x1a5   : > { %s2463_s26 = smov (!%p1444_p6), 0  }
 0x1aa LB: >> { %v820_v15 = vld [vmem:[%s1992_s9] sm:$0xff]  ;;  %v822_v16 = vld [vmem:[%s1992_s9 + $0x8] sm:$0xff]  ;;  %v824_v17 = vld [vmem:[%s1992_s9 + $0x10] sm:$0xff]  ;;  %s948_s5 = sadd.s32 1, %s1996_s25  ;;  %s814_s26 = sadd.s32 1, %s2000_s26   ;;  %s2000_s26 = sphi %s2463_s26, %s814_s26   ;;  %s1996_s25 = sphi %s2461_s25, %s2874_s25   ;;  %s1992_s9 = sphi %s2871_s9, %s2873_s9   ;;  %s1988_s10 = sphi %s2870_s10, %s2872_s10  }
 0x1ab   : >> { %821 = vst [vmem:[%s1988_s10] sm:$0xff] %v820_v15  ;;  %823 = vst [vmem:[%s1988_s10 + $0x8] sm:$0xff] %v822_v16  ;;  %v826_v18 = vld [vmem:[%s1992_s9 + $0x18] sm:$0xff]  ;;  %v828_v19 = vld [vmem:[%s1992_s9 + $0x20] sm:$0xff]  ;;  %p949_p7 = scmp.ge.s32.totalorder %s948_s5, %s2452_s11  ;;  %p813_p8 = scmp.ge.s32.totalorder %s814_s26, %s2452_s11 }
 0x1ac   : >> { %825 = vst [vmem:[%s1988_s10 + $0x10] sm:$0xff] %v824_v17  ;;  %v830_v20 = vld [vmem:[%s1992_s9 + $0x28] sm:$0xff]  ;;  %827 = vst [vmem:[%s1988_s10 + $0x18] sm:$0xff] %v826_v18  ;;  %v832_v21 = vld [vmem:[%s1992_s9 + $0x30] sm:$0xff] }
 0x1ad   : >> { %829 = vst [vmem:[%s1988_s10 + $0x20] sm:$0xff] %v828_v19  ;;  %831 = vst [vmem:[%s1988_s10 + $0x28] sm:$0xff] %v830_v20  ;;  %v834_v22 = vld [vmem:[%s1992_s9 + $0x38] sm:$0xff]  ;;  %v836_v23 = vld [vmem:[%s1992_s9 + $0x40] sm:$0xff]  ;;  %s2896_s5 = smov (%p949_p7, %s948_s5), 0 }
 0x1ae   : >> { %833 = vst [vmem:[%s1988_s10 + $0x30] sm:$0xff] %v832_v21  ;;  %835 = vst [vmem:[%s1988_s10 + $0x38] sm:$0xff] %v834_v22  ;;  %v838_v24 = vld [vmem:[%s1992_s9 + $0x48] sm:$0xff]  ;;  %v840_v25 = vld [vmem:[%s1992_s9 + $0x50] sm:$0xff]  ;;  %s1445_s7 = sshll.u32 %s2896_s5, 9  ;;  %s2874_s25 = smov %s2896_s5 }
 0x1af   : >> { %837 = vst [vmem:[%s1988_s10 + $0x40] sm:$0xff] %v836_v23  ;;  %v842_v26 = vld [vmem:[%s1992_s9 + $0x58] sm:$0xff]  ;;  %839 = vst [vmem:[%s1988_s10 + $0x48] sm:$0xff] %v838_v24  ;;  %v844_v27 = vld [vmem:[%s1992_s9 + $0x60] sm:$0xff]  ;;  %s2519_s8 = scalar_lea.vmem %s2428_s21, %s1445_s7 [#allocation3]   ;;  %s2522_s17 = scalar_lea.vmem %s2439_s28, %s1445_s7  }
 0x1b0   : >> { %841 = vst [vmem:[%s1988_s10 + $0x50] sm:$0xff] %v840_v25  ;;  %843 = vst [vmem:[%s1988_s10 + $0x58] sm:$0xff] %v842_v26  ;;  %v846_v28 = vld [vmem:[%s1992_s9 + $0x68] sm:$0xff]  ;;  %v848_v29 = vld [vmem:[%s1992_s9 + $0x70] sm:$0xff] }
 0x1b1   : >> { %845 = vst [vmem:[%s1988_s10 + $0x60] sm:$0xff] %v844_v27  ;;  %847 = vst [vmem:[%s1988_s10 + $0x68] sm:$0xff] %v846_v28  ;;  %v850_v30 = vld [vmem:[%s1992_s9 + $0x78] sm:$0xff]  ;;  %v852_v31 = vld [vmem:[%s1992_s9 + $0x80] sm:$0xff] }
 0x1b2   : >> { %849 = vst [vmem:[%s1988_s10 + $0x70] sm:$0xff] %v848_v29  ;;  %v854_v32 = vld [vmem:[%s1992_s9 + $0x88] sm:$0xff]  ;;  %851 = vst [vmem:[%s1988_s10 + $0x78] sm:$0xff] %v850_v30  ;;  %v856_v33 = vld [vmem:[%s1992_s9 + $0x90] sm:$0xff] }
 0x1b3   : >> { %853 = vst [vmem:[%s1988_s10 + $0x80] sm:$0xff] %v852_v31  ;;  %855 = vst [vmem:[%s1988_s10 + $0x88] sm:$0xff] %v854_v32  ;;  %v858_v34 = vld [vmem:[%s1992_s9 + $0x98] sm:$0xff]  ;;  %v860_v35 = vld [vmem:[%s1992_s9 + $0xa0] sm:$0xff] }
 0x1b4   : >> { %857 = vst [vmem:[%s1988_s10 + $0x90] sm:$0xff] %v856_v33  ;;  %859 = vst [vmem:[%s1988_s10 + $0x98] sm:$0xff] %v858_v34  ;;  %v862_v36 = vld [vmem:[%s1992_s9 + $0xa8] sm:$0xff]  ;;  %v864_v37 = vld [vmem:[%s1992_s9 + $0xb0] sm:$0xff] }
 0x1b5   : >> { %861 = vst [vmem:[%s1988_s10 + $0xa0] sm:$0xff] %v860_v35  ;;  %v866_v38 = vld [vmem:[%s1992_s9 + $0xb8] sm:$0xff]  ;;  %863 = vst [vmem:[%s1988_s10 + $0xa8] sm:$0xff] %v862_v36  ;;  %v868_v39 = vld [vmem:[%s1992_s9 + $0xc0] sm:$0xff] }
 0x1b6   : >> { %865 = vst [vmem:[%s1988_s10 + $0xb0] sm:$0xff] %v864_v37  ;;  %867 = vst [vmem:[%s1988_s10 + $0xb8] sm:$0xff] %v866_v38  ;;  %v870_v40 = vld [vmem:[%s1992_s9 + $0xc8] sm:$0xff]  ;;  %v872_v41 = vld [vmem:[%s1992_s9 + $0xd0] sm:$0xff] }
 0x1b7   : >> { %869 = vst [vmem:[%s1988_s10 + $0xc0] sm:$0xff] %v868_v39  ;;  %871 = vst [vmem:[%s1988_s10 + $0xc8] sm:$0xff] %v870_v40  ;;  %v874_v42 = vld [vmem:[%s1992_s9 + $0xd8] sm:$0xff]  ;;  %v876_v43 = vld [vmem:[%s1992_s9 + $0xe0] sm:$0xff] }
 0x1b8   : >> { %873 = vst [vmem:[%s1988_s10 + $0xd0] sm:$0xff] %v872_v41  ;;  %v878_v44 = vld [vmem:[%s1992_s9 + $0xe8] sm:$0xff]  ;;  %875 = vst [vmem:[%s1988_s10 + $0xd8] sm:$0xff] %v874_v42  ;;  %v880_v45 = vld [vmem:[%s1992_s9 + $0xf0] sm:$0xff] }
 0x1b9   : >> { %877 = vst [vmem:[%s1988_s10 + $0xe0] sm:$0xff] %v876_v43  ;;  %879 = vst [vmem:[%s1988_s10 + $0xe8] sm:$0xff] %v878_v44  ;;  %v882_v46 = vld [vmem:[%s1992_s9 + $0xf8] sm:$0xff]  ;;  %v884_v47 = vld [vmem:[%s1992_s9 + $0x100] sm:$0xff] }
 0x1ba   : >> { %881 = vst [vmem:[%s1988_s10 + $0xf0] sm:$0xff] %v880_v45  ;;  %883 = vst [vmem:[%s1988_s10 + $0xf8] sm:$0xff] %v882_v46  ;;  %v886_v48 = vld [vmem:[%s1992_s9 + $0x108] sm:$0xff]  ;;  %v888_v49 = vld [vmem:[%s1992_s9 + $0x110] sm:$0xff] }
 0x1bb   : >> { %885 = vst [vmem:[%s1988_s10 + $0x100] sm:$0xff] %v884_v47  ;;  %v890_v50 = vld [vmem:[%s1992_s9 + $0x118] sm:$0xff]  ;;  %887 = vst [vmem:[%s1988_s10 + $0x108] sm:$0xff] %v886_v48  ;;  %v892_v51 = vld [vmem:[%s1992_s9 + $0x120] sm:$0xff] }
 0x1bc   : >> { %889 = vst [vmem:[%s1988_s10 + $0x110] sm:$0xff] %v888_v49  ;;  %891 = vst [vmem:[%s1988_s10 + $0x118] sm:$0xff] %v890_v50  ;;  %v894_v52 = vld [vmem:[%s1992_s9 + $0x128] sm:$0xff]  ;;  %v896_v53 = vld [vmem:[%s1992_s9 + $0x130] sm:$0xff] }
 0x1bd   : >> { %893 = vst [vmem:[%s1988_s10 + $0x120] sm:$0xff] %v892_v51  ;;  %895 = vst [vmem:[%s1988_s10 + $0x128] sm:$0xff] %v894_v52  ;;  %v898_v54 = vld [vmem:[%s1992_s9 + $0x138] sm:$0xff]  ;;  %v900_v55 = vld [vmem:[%s1992_s9 + $0x140] sm:$0xff] }
 0x1be   : >> { %897 = vst [vmem:[%s1988_s10 + $0x130] sm:$0xff] %v896_v53  ;;  %v902_v56 = vld [vmem:[%s1992_s9 + $0x148] sm:$0xff]  ;;  %899 = vst [vmem:[%s1988_s10 + $0x138] sm:$0xff] %v898_v54  ;;  %v904_v57 = vld [vmem:[%s1992_s9 + $0x150] sm:$0xff] }
 0x1bf   : >> { %901 = vst [vmem:[%s1988_s10 + $0x140] sm:$0xff] %v900_v55  ;;  %903 = vst [vmem:[%s1988_s10 + $0x148] sm:$0xff] %v902_v56  ;;  %v906_v58 = vld [vmem:[%s1992_s9 + $0x158] sm:$0xff]  ;;  %v908_v59 = vld [vmem:[%s1992_s9 + $0x160] sm:$0xff] }
 0x1c0   : >> { %905 = vst [vmem:[%s1988_s10 + $0x150] sm:$0xff] %v904_v57  ;;  %907 = vst [vmem:[%s1988_s10 + $0x158] sm:$0xff] %v906_v58  ;;  %v910_v60 = vld [vmem:[%s1992_s9 + $0x168] sm:$0xff]  ;;  %v912_v61 = vld [vmem:[%s1992_s9 + $0x170] sm:$0xff] }
 0x1c1   : >> { %909 = vst [vmem:[%s1988_s10 + $0x160] sm:$0xff] %v908_v59  ;;  %v914_v62 = vld [vmem:[%s1992_s9 + $0x178] sm:$0xff]  ;;  %911 = vst [vmem:[%s1988_s10 + $0x168] sm:$0xff] %v910_v60  ;;  %v916_v63 = vld [vmem:[%s1992_s9 + $0x180] sm:$0xff] }
 0x1c2   : >> { %913 = vst [vmem:[%s1988_s10 + $0x170] sm:$0xff] %v912_v61  ;;  %915 = vst [vmem:[%s1988_s10 + $0x178] sm:$0xff] %v914_v62  ;;  %v918_v0 = vld [vmem:[%s1992_s9 + $0x188] sm:$0xff]  ;;  %v920_v1 = vld [vmem:[%s1992_s9 + $0x190] sm:$0xff] }
 0x1c3   : >> { %917 = vst [vmem:[%s1988_s10 + $0x180] sm:$0xff] %v916_v63  ;;  %919 = vst [vmem:[%s1988_s10 + $0x188] sm:$0xff] %v918_v0  ;;  %v922_v2 = vld [vmem:[%s1992_s9 + $0x198] sm:$0xff]  ;;  %v924_v3 = vld [vmem:[%s1992_s9 + $0x1a0] sm:$0xff] }
 0x1c4   : >> { %921 = vst [vmem:[%s1988_s10 + $0x190] sm:$0xff] %v920_v1  ;;  %v926_v4 = vld [vmem:[%s1992_s9 + $0x1a8] sm:$0xff]  ;;  %923 = vst [vmem:[%s1988_s10 + $0x198] sm:$0xff] %v922_v2  ;;  %v928_v5 = vld [vmem:[%s1992_s9 + $0x1b0] sm:$0xff]  ;;  %816 = sbr.rel (!%p813_p8) target bundleno = 426 (0x1aa), region = 283 }
 0x1c5   : >> { %925 = vst [vmem:[%s1988_s10 + $0x1a0] sm:$0xff] %v924_v3  ;;  %927 = vst [vmem:[%s1988_s10 + $0x1a8] sm:$0xff] %v926_v4  ;;  %v930_v6 = vld [vmem:[%s1992_s9 + $0x1b8] sm:$0xff]  ;;  %v932_v7 = vld [vmem:[%s1992_s9 + $0x1c0] sm:$0xff] }
 0x1c6   : >> { %929 = vst [vmem:[%s1988_s10 + $0x1b0] sm:$0xff] %v928_v5  ;;  %931 = vst [vmem:[%s1988_s10 + $0x1b8] sm:$0xff] %v930_v6  ;;  %v934_v8 = vld [vmem:[%s1992_s9 + $0x1c8] sm:$0xff]  ;;  %v936_v9 = vld [vmem:[%s1992_s9 + $0x1d0] sm:$0xff] }
 0x1c7   : >> { %933 = vst [vmem:[%s1988_s10 + $0x1c0] sm:$0xff] %v932_v7  ;;  %v938_v10 = vld [vmem:[%s1992_s9 + $0x1d8] sm:$0xff]  ;;  %935 = vst [vmem:[%s1988_s10 + $0x1c8] sm:$0xff] %v934_v8  ;;  %v940_v11 = vld [vmem:[%s1992_s9 + $0x1e0] sm:$0xff] }
 0x1c8   : >> { %937 = vst [vmem:[%s1988_s10 + $0x1d0] sm:$0xff] %v936_v9  ;;  %939 = vst [vmem:[%s1988_s10 + $0x1d8] sm:$0xff] %v938_v10  ;;  %v942_v12 = vld [vmem:[%s1992_s9 + $0x1e8] sm:$0xff]  ;;  %v944_v13 = vld [vmem:[%s1992_s9 + $0x1f0] sm:$0xff] }
 0x1c9   : >> { %941 = vst [vmem:[%s1988_s10 + $0x1e0] sm:$0xff] %v940_v11  ;;  %943 = vst [vmem:[%s1988_s10 + $0x1e8] sm:$0xff] %v942_v12  ;;  %v946_v14 = vld [vmem:[%s1992_s9 + $0x1f8] sm:$0xff]  ;;  %s2873_s9 = smov %s2519_s8 }
 0x1ca   : >> { %945 = vst [vmem:[%s1988_s10 + $0x1f0] sm:$0xff] %v944_v13  ;;  %947 = vst [vmem:[%s1988_s10 + $0x1f8] sm:$0xff] %v946_v14  ;;  %s2872_s10 = smov %s2522_s17 }
 0x1cb PF: > { %s2628_s13 = sand.u32 63, %s807_s18   ;;  %s1471_s20 = sshll.u32 %s2452_s11, 13 }
 0x1cc   : > { %s959_s12 = sshra.s32 %s1471_s20, 4  ;;  %p1450_p9 = scmp.le.s32.totalorder %s2628_s13, 0 }
 0x1cd   : > { %s960_s15 = scalar_lea.vmem %s2428_s21, %s959_s12 [#allocation3]   ;;  %s963_s6 = scalar_lea.vmem %s2439_s28, %s959_s12  }
 0x1ce   : > { %1344 = sbr.rel (%p1450_p9) target bundleno = 479 (0x1df), region = 288  ;;  %s2002_s24 = smov (!%p1450_p9), %s963_s6  }
 0x1cf   : > { %s2006_s27 = smov (!%p1450_p9), %s960_s15   ;;  %s2010_s14 = smov (!%p1450_p9), 0  }
 0x1d0   : > { %s2014_s29 = smov (!%p1450_p9), 0  }
 0x1d5 LB: >> { %v975_v15 = vld [vmem:[%s2008_s27] sm:$0xff]  ;;  %s977_s18 = sadd.s32 1, %s2012_s14  ;;  %s969_s29 = sadd.s32 1, %s2016_s29   ;;  %s2016_s29 = sphi %s2014_s29, %s969_s29   ;;  %s2012_s14 = sphi %s2010_s14, %s2011_s14   ;;  %s2008_s27 = sphi %s2006_s27, %s982_s27   ;;  %s2004_s24 = sphi %s2002_s24, %s983_s24  }
 0x1d6   : >> { %976 = vst [vmem:[%s2004_s24] sm:$0xff] %v975_v15  ;;  %p978_p10 = scmp.ge.s32.totalorder %s977_s18, %s2628_s13  ;;  %p968_p11 = scmp.ge.s32.totalorder %s969_s29, %s2628_s13 }
 0x1d8   : >> { %s2898_s18 = smov (%p978_p10, %s977_s18), 0  ;;  %971 = sbr.rel (!%p968_p11) target bundleno = 469 (0x1d5), region = 294 }
 0x1d9   : >> { %s1451_s11 = sshll.u32 %s2898_s18, 3  ;;  %s2011_s14 = smov %s2898_s18  }
 0x1da   : >> { %s982_s27 = scalar_lea.vmem %s960_s15, %s1451_s11 [#allocation3]   ;;  %s983_s24 = scalar_lea.vmem %s963_s6, %s1451_s11  }
 0x1df PF: > { %986 = sbr.rel (%p803_p5) target bundleno = 550 (0x226), region = 147  ;;  %s2640_s10 = ssub.s32 (!%p803_p5), %s2441_s30, %s2445_s23 }
 0x1e0   : > { %s992_s9 = sshrl.u32 (!%p803_p5), %s2441_s30, 3  ;;  %s989_s25 = scalar_lea.vmem (!%p803_p5), %s2428_s21, %s2640_s10 [#allocation3] }
 0x1e1   : > { %s991_s26 = scalar_lea.vmem (!%p803_p5), %s2439_s28, %s2640_s10  ;;  %s2649_s5 = sshrl.u32 (!%p803_p5), %s992_s9, 6 }
 0x1e2   : > { %p1453_p12 = scmp.le.s32.totalorder (!%p803_p5), %s2649_s5, 0 }
 0x1e6   : > { %1358 = sbr.rel (%p1453_p12) target bundleno = 526 (0x20e), region = 299  ;;  %s2875_s7 = smov (!%p1453_p12), %s2439_s28 }
 0x1e7   : > { %s2876_s8 = smov (!%p1453_p12), %s2428_s21  ;;  %s2658_s17 = smov (!%p1453_p12), 0  }
 0x1e8   : > { %s2660_s13 = smov (!%p1453_p12), 0  }
 0x1ed LB: >> { %v1005_v16 = vld [vmem:[%s2024_s8] sm:$0xff]  ;;  %v1007_v17 = vld [vmem:[%s2024_s8 + $0x8] sm:$0xff]  ;;  %v1009_v18 = vld [vmem:[%s2024_s8 + $0x10] sm:$0xff]  ;;  %s1133_s20 = sadd.s32 1, %s2028_s17  ;;  %s999_s13 = sadd.s32 1, %s2032_s13   ;;  %s2032_s13 = sphi %s2660_s13, %s999_s13   ;;  %s2028_s17 = sphi %s2658_s17, %s2879_s17   ;;  %s2024_s8 = sphi %s2876_s8, %s2878_s8   ;;  %s2020_s7 = sphi %s2875_s7, %s2877_s7  }
 0x1ee   : >> { %1006 = vst [vmem:[%s2020_s7] sm:$0xff] %v1005_v16  ;;  %1008 = vst [vmem:[%s2020_s7 + $0x8] sm:$0xff] %v1007_v17  ;;  %v1011_v19 = vld [vmem:[%s2024_s8 + $0x18] sm:$0xff]  ;;  %v1013_v20 = vld [vmem:[%s2024_s8 + $0x20] sm:$0xff]  ;;  %p1134_p13 = scmp.ge.s32.totalorder %s1133_s20, %s2649_s5  ;;  %p998_p0 = scmp.ge.s32.totalorder %s999_s13, %s2649_s5 }
 0x1ef   : >> { %1010 = vst [vmem:[%s2020_s7 + $0x10] sm:$0xff] %v1009_v18  ;;  %v1015_v21 = vld [vmem:[%s2024_s8 + $0x28] sm:$0xff]  ;;  %1012 = vst [vmem:[%s2020_s7 + $0x18] sm:$0xff] %v1011_v19  ;;  %v1017_v22 = vld [vmem:[%s2024_s8 + $0x30] sm:$0xff] }
 0x1f0   : >> { %1014 = vst [vmem:[%s2020_s7 + $0x20] sm:$0xff] %v1013_v20  ;;  %1016 = vst [vmem:[%s2020_s7 + $0x28] sm:$0xff] %v1015_v21  ;;  %v1019_v23 = vld [vmem:[%s2024_s8 + $0x38] sm:$0xff]  ;;  %v1021_v24 = vld [vmem:[%s2024_s8 + $0x40] sm:$0xff]  ;;  %s2900_s20 = smov (%p1134_p13, %s1133_s20), 0 }
 0x1f1   : >> { %1018 = vst [vmem:[%s2020_s7 + $0x30] sm:$0xff] %v1017_v22  ;;  %1020 = vst [vmem:[%s2020_s7 + $0x38] sm:$0xff] %v1019_v23  ;;  %v1023_v25 = vld [vmem:[%s2024_s8 + $0x48] sm:$0xff]  ;;  %v1025_v26 = vld [vmem:[%s2024_s8 + $0x50] sm:$0xff]  ;;  %s1454_s12 = sshll.u32 %s2900_s20, 9  ;;  %s2879_s17 = smov %s2900_s20 }
 0x1f2   : >> { %1022 = vst [vmem:[%s2020_s7 + $0x40] sm:$0xff] %v1021_v24  ;;  %v1027_v27 = vld [vmem:[%s2024_s8 + $0x58] sm:$0xff]  ;;  %1024 = vst [vmem:[%s2020_s7 + $0x48] sm:$0xff] %v1023_v25  ;;  %v1029_v28 = vld [vmem:[%s2024_s8 + $0x60] sm:$0xff]  ;;  %s2716_s15 = scalar_lea.vmem %s2428_s21, %s1454_s12 [#allocation3]   ;;  %s2719_s6 = scalar_lea.vmem %s2439_s28, %s1454_s12  }
 0x1f3   : >> { %1026 = vst [vmem:[%s2020_s7 + $0x50] sm:$0xff] %v1025_v26  ;;  %1028 = vst [vmem:[%s2020_s7 + $0x58] sm:$0xff] %v1027_v27  ;;  %v1031_v29 = vld [vmem:[%s2024_s8 + $0x68] sm:$0xff]  ;;  %v1033_v30 = vld [vmem:[%s2024_s8 + $0x70] sm:$0xff] }
 0x1f4   : >> { %1030 = vst [vmem:[%s2020_s7 + $0x60] sm:$0xff] %v1029_v28  ;;  %1032 = vst [vmem:[%s2020_s7 + $0x68] sm:$0xff] %v1031_v29  ;;  %v1035_v31 = vld [vmem:[%s2024_s8 + $0x78] sm:$0xff]  ;;  %v1037_v32 = vld [vmem:[%s2024_s8 + $0x80] sm:$0xff] }
 0x1f5   : >> { %1034 = vst [vmem:[%s2020_s7 + $0x70] sm:$0xff] %v1033_v30  ;;  %v1039_v33 = vld [vmem:[%s2024_s8 + $0x88] sm:$0xff]  ;;  %1036 = vst [vmem:[%s2020_s7 + $0x78] sm:$0xff] %v1035_v31  ;;  %v1041_v34 = vld [vmem:[%s2024_s8 + $0x90] sm:$0xff] }
 0x1f6   : >> { %1038 = vst [vmem:[%s2020_s7 + $0x80] sm:$0xff] %v1037_v32  ;;  %1040 = vst [vmem:[%s2020_s7 + $0x88] sm:$0xff] %v1039_v33  ;;  %v1043_v35 = vld [vmem:[%s2024_s8 + $0x98] sm:$0xff]  ;;  %v1045_v36 = vld [vmem:[%s2024_s8 + $0xa0] sm:$0xff] }
 0x1f7   : >> { %1042 = vst [vmem:[%s2020_s7 + $0x90] sm:$0xff] %v1041_v34  ;;  %1044 = vst [vmem:[%s2020_s7 + $0x98] sm:$0xff] %v1043_v35  ;;  %v1047_v37 = vld [vmem:[%s2024_s8 + $0xa8] sm:$0xff]  ;;  %v1049_v38 = vld [vmem:[%s2024_s8 + $0xb0] sm:$0xff] }
 0x1f8   : >> { %1046 = vst [vmem:[%s2020_s7 + $0xa0] sm:$0xff] %v1045_v36  ;;  %v1051_v39 = vld [vmem:[%s2024_s8 + $0xb8] sm:$0xff]  ;;  %1048 = vst [vmem:[%s2020_s7 + $0xa8] sm:$0xff] %v1047_v37  ;;  %v1053_v40 = vld [vmem:[%s2024_s8 + $0xc0] sm:$0xff] }
 0x1f9   : >> { %1050 = vst [vmem:[%s2020_s7 + $0xb0] sm:$0xff] %v1049_v38  ;;  %1052 = vst [vmem:[%s2020_s7 + $0xb8] sm:$0xff] %v1051_v39  ;;  %v1055_v41 = vld [vmem:[%s2024_s8 + $0xc8] sm:$0xff]  ;;  %v1057_v42 = vld [vmem:[%s2024_s8 + $0xd0] sm:$0xff] }
 0x1fa   : >> { %1054 = vst [vmem:[%s2020_s7 + $0xc0] sm:$0xff] %v1053_v40  ;;  %1056 = vst [vmem:[%s2020_s7 + $0xc8] sm:$0xff] %v1055_v41  ;;  %v1059_v43 = vld [vmem:[%s2024_s8 + $0xd8] sm:$0xff]  ;;  %v1061_v44 = vld [vmem:[%s2024_s8 + $0xe0] sm:$0xff] }
 0x1fb   : >> { %1058 = vst [vmem:[%s2020_s7 + $0xd0] sm:$0xff] %v1057_v42  ;;  %v1063_v45 = vld [vmem:[%s2024_s8 + $0xe8] sm:$0xff]  ;;  %1060 = vst [vmem:[%s2020_s7 + $0xd8] sm:$0xff] %v1059_v43  ;;  %v1065_v46 = vld [vmem:[%s2024_s8 + $0xf0] sm:$0xff] }
 0x1fc   : >> { %1062 = vst [vmem:[%s2020_s7 + $0xe0] sm:$0xff] %v1061_v44  ;;  %1064 = vst [vmem:[%s2020_s7 + $0xe8] sm:$0xff] %v1063_v45  ;;  %v1067_v47 = vld [vmem:[%s2024_s8 + $0xf8] sm:$0xff]  ;;  %v1069_v48 = vld [vmem:[%s2024_s8 + $0x100] sm:$0xff] }
 0x1fd   : >> { %1066 = vst [vmem:[%s2020_s7 + $0xf0] sm:$0xff] %v1065_v46  ;;  %1068 = vst [vmem:[%s2020_s7 + $0xf8] sm:$0xff] %v1067_v47  ;;  %v1071_v49 = vld [vmem:[%s2024_s8 + $0x108] sm:$0xff]  ;;  %v1073_v50 = vld [vmem:[%s2024_s8 + $0x110] sm:$0xff] }
 0x1fe   : >> { %1070 = vst [vmem:[%s2020_s7 + $0x100] sm:$0xff] %v1069_v48  ;;  %v1075_v51 = vld [vmem:[%s2024_s8 + $0x118] sm:$0xff]  ;;  %1072 = vst [vmem:[%s2020_s7 + $0x108] sm:$0xff] %v1071_v49  ;;  %v1077_v52 = vld [vmem:[%s2024_s8 + $0x120] sm:$0xff] }
 0x1ff   : >> { %1074 = vst [vmem:[%s2020_s7 + $0x110] sm:$0xff] %v1073_v50  ;;  %1076 = vst [vmem:[%s2020_s7 + $0x118] sm:$0xff] %v1075_v51  ;;  %v1079_v53 = vld [vmem:[%s2024_s8 + $0x128] sm:$0xff]  ;;  %v1081_v54 = vld [vmem:[%s2024_s8 + $0x130] sm:$0xff] }
 0x200   : >> { %1078 = vst [vmem:[%s2020_s7 + $0x120] sm:$0xff] %v1077_v52  ;;  %1080 = vst [vmem:[%s2020_s7 + $0x128] sm:$0xff] %v1079_v53  ;;  %v1083_v55 = vld [vmem:[%s2024_s8 + $0x138] sm:$0xff]  ;;  %v1085_v56 = vld [vmem:[%s2024_s8 + $0x140] sm:$0xff] }
 0x201   : >> { %1082 = vst [vmem:[%s2020_s7 + $0x130] sm:$0xff] %v1081_v54  ;;  %v1087_v57 = vld [vmem:[%s2024_s8 + $0x148] sm:$0xff]  ;;  %1084 = vst [vmem:[%s2020_s7 + $0x138] sm:$0xff] %v1083_v55  ;;  %v1089_v58 = vld [vmem:[%s2024_s8 + $0x150] sm:$0xff] }
 0x202   : >> { %1086 = vst [vmem:[%s2020_s7 + $0x140] sm:$0xff] %v1085_v56  ;;  %1088 = vst [vmem:[%s2020_s7 + $0x148] sm:$0xff] %v1087_v57  ;;  %v1091_v59 = vld [vmem:[%s2024_s8 + $0x158] sm:$0xff]  ;;  %v1093_v60 = vld [vmem:[%s2024_s8 + $0x160] sm:$0xff] }
 0x203   : >> { %1090 = vst [vmem:[%s2020_s7 + $0x150] sm:$0xff] %v1089_v58  ;;  %1092 = vst [vmem:[%s2020_s7 + $0x158] sm:$0xff] %v1091_v59  ;;  %v1095_v61 = vld [vmem:[%s2024_s8 + $0x168] sm:$0xff]  ;;  %v1097_v62 = vld [vmem:[%s2024_s8 + $0x170] sm:$0xff] }
 0x204   : >> { %1094 = vst [vmem:[%s2020_s7 + $0x160] sm:$0xff] %v1093_v60  ;;  %v1099_v63 = vld [vmem:[%s2024_s8 + $0x178] sm:$0xff]  ;;  %1096 = vst [vmem:[%s2020_s7 + $0x168] sm:$0xff] %v1095_v61  ;;  %v1101_v0 = vld [vmem:[%s2024_s8 + $0x180] sm:$0xff] }
 0x205   : >> { %1098 = vst [vmem:[%s2020_s7 + $0x170] sm:$0xff] %v1097_v62  ;;  %1100 = vst [vmem:[%s2020_s7 + $0x178] sm:$0xff] %v1099_v63  ;;  %v1103_v1 = vld [vmem:[%s2024_s8 + $0x188] sm:$0xff]  ;;  %v1105_v2 = vld [vmem:[%s2024_s8 + $0x190] sm:$0xff] }
 0x206   : >> { %1102 = vst [vmem:[%s2020_s7 + $0x180] sm:$0xff] %v1101_v0  ;;  %1104 = vst [vmem:[%s2020_s7 + $0x188] sm:$0xff] %v1103_v1  ;;  %v1107_v3 = vld [vmem:[%s2024_s8 + $0x198] sm:$0xff]  ;;  %v1109_v4 = vld [vmem:[%s2024_s8 + $0x1a0] sm:$0xff] }
 0x207   : >> { %1106 = vst [vmem:[%s2020_s7 + $0x190] sm:$0xff] %v1105_v2  ;;  %v1111_v5 = vld [vmem:[%s2024_s8 + $0x1a8] sm:$0xff]  ;;  %1108 = vst [vmem:[%s2020_s7 + $0x198] sm:$0xff] %v1107_v3  ;;  %v1113_v6 = vld [vmem:[%s2024_s8 + $0x1b0] sm:$0xff]  ;;  %1001 = sbr.rel (!%p998_p0) target bundleno = 493 (0x1ed), region = 305 }
 0x208   : >> { %1110 = vst [vmem:[%s2020_s7 + $0x1a0] sm:$0xff] %v1109_v4  ;;  %1112 = vst [vmem:[%s2020_s7 + $0x1a8] sm:$0xff] %v1111_v5  ;;  %v1115_v7 = vld [vmem:[%s2024_s8 + $0x1b8] sm:$0xff]  ;;  %v1117_v8 = vld [vmem:[%s2024_s8 + $0x1c0] sm:$0xff] }
 0x209   : >> { %1114 = vst [vmem:[%s2020_s7 + $0x1b0] sm:$0xff] %v1113_v6  ;;  %1116 = vst [vmem:[%s2020_s7 + $0x1b8] sm:$0xff] %v1115_v7  ;;  %v1119_v9 = vld [vmem:[%s2024_s8 + $0x1c8] sm:$0xff]  ;;  %v1121_v10 = vld [vmem:[%s2024_s8 + $0x1d0] sm:$0xff] }
 0x20a   : >> { %1118 = vst [vmem:[%s2020_s7 + $0x1c0] sm:$0xff] %v1117_v8  ;;  %v1123_v11 = vld [vmem:[%s2024_s8 + $0x1d8] sm:$0xff]  ;;  %1120 = vst [vmem:[%s2020_s7 + $0x1c8] sm:$0xff] %v1119_v9  ;;  %v1125_v12 = vld [vmem:[%s2024_s8 + $0x1e0] sm:$0xff] }
 0x20b   : >> { %1122 = vst [vmem:[%s2020_s7 + $0x1d0] sm:$0xff] %v1121_v10  ;;  %1124 = vst [vmem:[%s2020_s7 + $0x1d8] sm:$0xff] %v1123_v11  ;;  %v1127_v13 = vld [vmem:[%s2024_s8 + $0x1e8] sm:$0xff]  ;;  %v1129_v14 = vld [vmem:[%s2024_s8 + $0x1f0] sm:$0xff] }
 0x20c   : >> { %1126 = vst [vmem:[%s2020_s7 + $0x1e0] sm:$0xff] %v1125_v12  ;;  %1128 = vst [vmem:[%s2020_s7 + $0x1e8] sm:$0xff] %v1127_v13  ;;  %v1131_v15 = vld [vmem:[%s2024_s8 + $0x1f8] sm:$0xff]  ;;  %s2878_s8 = smov %s2716_s15 }
 0x20d   : >> { %1130 = vst [vmem:[%s2020_s7 + $0x1f0] sm:$0xff] %v1129_v14  ;;  %1132 = vst [vmem:[%s2020_s7 + $0x1f8] sm:$0xff] %v1131_v15  ;;  %s2877_s7 = smov %s2719_s6 }
 0x20e PF: > { %s2825_s24 = sand.u32 63, %s992_s9   ;;  %s1473_s27 = sshll.u32 %s2649_s5, 13 }
 0x20f   : > { %s1144_s14 = sshra.s32 %s1473_s27, 4  ;;  %p1459_p1 = scmp.le.s32.totalorder %s2825_s24, 0 }
 0x210   : > { %s1145_s29 = scalar_lea.vmem %s2428_s21, %s1144_s14 [#allocation3]   ;;  %s1148_s18 = scalar_lea.vmem %s2439_s28, %s1144_s14  }
 0x211   : > { %1372 = sbr.rel (%p1459_p1) target bundleno = 546 (0x222), region = 310  ;;  %s2034_s11 = smov (!%p1459_p1), %s1148_s18  }
 0x212   : > { %s2038_s20 = smov (!%p1459_p1), %s1145_s29   ;;  %s2042_s12 = smov (!%p1459_p1), 0  }
 0x213   : > { %s2046_s13 = smov (!%p1459_p1), 0  }
 0x218 LB: >> { %v1160_v16 = vld [vmem:[%s2040_s20] sm:$0xff]  ;;  %s1162_s9 = sadd.s32 1, %s2044_s12  ;;  %s1154_s13 = sadd.s32 1, %s2048_s13   ;;  %s2048_s13 = sphi %s2046_s13, %s1154_s13   ;;  %s2044_s12 = sphi %s2042_s12, %s2043_s12   ;;  %s2040_s20 = sphi %s2038_s20, %s1167_s20   ;;  %s2036_s11 = sphi %s2034_s11, %s1168_s11  }
 0x219   : >> { %1161 = vst [vmem:[%s2036_s11] sm:$0xff] %v1160_v16  ;;  %p1163_p2 = scmp.ge.s32.totalorder %s1162_s9, %s2825_s24  ;;  %p1153_p3 = scmp.ge.s32.totalorder %s1154_s13, %s2825_s24 }
 0x21b   : >> { %s2902_s9 = smov (%p1163_p2, %s1162_s9), 0  ;;  %1156 = sbr.rel (!%p1153_p3) target bundleno = 536 (0x218), region = 316 }
 0x21c   : >> { %s1460_s5 = sshll.u32 %s2902_s9, 3  ;;  %s2043_s12 = smov %s2902_s9  }
 0x21d   : >> { %s1167_s20 = scalar_lea.vmem %s1145_s29, %s1460_s5 [#allocation3]   ;;  %s1168_s11 = scalar_lea.vmem %s1148_s18, %s1460_s5  }
 0x222 PF: > { %s2054_s7 = smov 0  }
 0x223   : > { %s1169_s8 = sshllo.u32 %s2054_s7, %s2445_s23 }
 0x224   : > { %v1178_v17 = vld [vmem:[%s989_s25] sm:%s1169_s8] }
 0x225   : > { %1179 = vst [vmem:[%s991_s26] sm:%s1169_s8] %v1178_v17 }
 0x226 PF: > { %p1462_p5 = scmp.ge.u32.totalorder %s2441_s30, 8 }
 0x227   : > { %s2055_s17 = smov (!%p1462_p5), 0  }
 0x228   : > { %790 = sbr.rel (%p1462_p5) target bundleno = 559 (0x22f), region = 118  ;;  %s791_s15 = sshllo.u32 (!%p1462_p5), %s2055_s17, %s2441_s30 }
 0x229   : > { %v800_v18 = vld [vmem:[%s2428_s21] sm:%s791_s15] (!%p1462_p5) }
 0x22a   : > { %801 = vst [vmem:[%s2439_s28] sm:%s791_s15] (!%p1462_p5), %v800_v18 }
 0x22f PF: > { %p11_p4 = scmp.ge.s32.totalorder %s2100_s19, 4   ;;  %s2880_s15 = smov %s1916_s16 }
 0x230   : > { %s2881_s16 = smov %s2110_s22  ;;  %s2882_s17 = smov %s2100_s19 }
 0x231   :  { %13 = sbr.rel (!%p11_p4) target bundleno = 2 (0x2), region = 327 }

</bundles_post_ra>
